<compile_context>
chip_gen: v7x
topology: tpu7x:2x2x1
jax: 0.10.0
libtpu: 0.0.40
codegen_flags: <defaults>
</compile_context>

<pallas_src>
import functools

import jax
import jax.numpy as jnp
from jax import lax
from jax.experimental import pallas as pl
from jax.experimental.pallas import tpu as pltpu


def _round_up(x, m):
    return ((x + m - 1) // m) * m


def _cdiv(a, b):
    return (a + b - 1) // b


def _softplus(x):
    # Numerically stable log(1 + exp(x)).
    return jnp.maximum(x, 0.0) + jnp.log1p(jnp.exp(-jnp.abs(x)))


def _logistic_loss_kernel(
    pos_ref, w_ref, neg_ref, out_ref, *, tp, tn, p_valid, n_valid, neg_scale,
    mask_rows, mask_cols,
):
    i = pl.program_id(0)   # P-chunk ("parallel")
    k = pl.program_id(1)   # N-chunk ("arbitrary" reduction, innermost)

    # (TP, TN) tile of negative scores; in-kernel upcast to f32 (VPU).
    # BCE-with-logits(target=0) == softplus(x); 2 EUP transcendentals / element.
    sp_neg = _softplus(neg_ref[...].astype(jnp.float32))

    # Mask the ragged edge of the UNPADDED (P, N) array in-kernel.  The masks are
    # built only when the static shapes require them (compile-time bools); garbage
    # in out-of-bounds block regions (possibly NaN/Inf) is killed by the select.
    if mask_rows or mask_cols:
        valid = None
        if mask_rows:
            row_ids = lax.broadcasted_iota(jnp.int32, (tp, 1), 0) + i * tp
            valid = row_ids < p_valid
        if mask_cols:
            col_ids = lax.broadcasted_iota(jnp.int32, (1, tn), 1) + k * tn
            cmask = col_ids < n_valid
            valid = cmask if valid is None else (valid & cmask)
        sp_neg = jnp.where(valid, sp_neg, 0.0)

    # Lane reduce on the XLU (overlaps EUP/VPU work): (TP, TN) -> (TP, 1).
    row_sums = jnp.sum(sp_neg, axis=1, keepdims=True)

    # Tiny weighted contraction (1,TP)@(TP,1) -> (1,1); HIGHEST only here.
    w = w_ref[...].astype(jnp.float32)  # (1, TP) lane-dense
    neg_part = jnp.dot(
        w, row_sums,
        precision=lax.Precision.HIGHEST,
        preferred_element_type=jnp.float32,
    ) * neg_scale  # fold 1/N once per tile, on the scalar

    # First visit of this output block: initialize with the positive-pair loss.
    @pl.when(k == 0)
    def _():
        pos = pos_ref[...].astype(jnp.float32)      # (1, TP), lane-dense
        # BCE-with-logits(target=1) == softplus(-x); padded lanes have weight 0.
        out_ref[0] = jnp.sum(w * _softplus(-pos), axis=1, keepdims=True)

    # Accumulate the negative contribution across the resident output block.
    out_ref[0] = out_ref[0] + neg_part


def logistic_loss(pos_scores, neg_scores, weight=None, *, max_tp=256, max_tn=4096):
    """Pallas-backed equivalent of LogisticLossFunction.forward.

    pos_scores: (P,) float          scores of positive pairs
    neg_scores: (P, N) float        scores of negative pairs
    weight:     optional (P,) float per-positive weight
    returns:    scalar float32 loss

    Inputs may be bf16/f32; they are streamed in native dtype and upcast in-kernel.
    """
    assert max_tp % 128 == 0 and max_tn % 128 == 0
    (P,) = pos_scores.shape
    P2, N = neg_scores.shape
    assert P == P2, "pos_scores and neg_scores must agree on P"

    if weight is None:
        weight = jnp.ones((P,), dtype=pos_scores.dtype)

    if P == 0 or N == 0:
        # Degenerate cases: no negatives (or nothing at all) -> positive part only.
        return jnp.sum(weight.astype(jnp.float32) * _softplus(-pos_scores.astype(jnp.float32)))

    # ---- tile sizes (no padding of the big matrix) -------------------------
    # P axis: >= 2 chunks when P > 128 so both TensorCores are used on v7x.
    # When chunked, TP must be a multiple of 128 so the (1, TP) lane-dense
    # pos/weight blocks stay legal; otherwise use the full extent (always legal).
    if P > 128:
        TP = min(max_tp, _round_up(_cdiv(P, 2), 128))
        GP = _cdiv(P, TP)
        P_pad = GP * TP
    else:
        TP, GP, P_pad = P, 1, P

    # N axis: full extent if it fits in one tile, else 128-aligned chunks.
    if N > max_tn:
        TN = max_tn
        GN = _cdiv(N, TN)
    else:
        TN, GN = N, 1

    mask_rows = (P % TP) != 0
    mask_cols = (N % TN) != 0

    # Only the tiny (P,) vectors ever get padded (zero weight => exact masking of
    # padded positive lanes, including the ln(2) from softplus(0)).
    pos_row = pos_scores.reshape(1, P)
    w_row = weight.reshape(1, P)
    if P_pad > P:
        pos_row = jnp.pad(pos_row, ((0, 0), (0, P_pad - P)))
        w_row = jnp.pad(w_row, ((0, 0), (0, P_pad - P)))

    neg_scale = 1.0 / N

    itemsize = jnp.dtype(neg_scores.dtype).itemsize
    cost = pl.CostEstimate(
        flops=int(4 * P * N),            # adds/compares around the transcendentals
        transcendentals=int(2 * P * N),  # exp + log1p per negative score
        bytes_accessed=int(P * N * itemsize + 2 * P * itemsize + GP * 4),
    )

    partials = pl.pallas_call(
        functools.partial(
            _logistic_loss_kernel,
            tp=TP, tn=TN, p_valid=P, n_valid=N, neg_scale=neg_scale,
            mask_rows=mask_rows, mask_cols=mask_cols,
        ),
        out_shape=jax.ShapeDtypeStruct((GP, 1, 1), jnp.float32),
        grid=(GP, GN),
        in_specs=[
            pl.BlockSpec((1, TP), lambda i, k: (0, i)),    # pos scores (lane-dense row)
            pl.BlockSpec((1, TP), lambda i, k: (0, i)),    # weights    (lane-dense row)
            pl.BlockSpec((TP, TN), lambda i, k: (i, k)),   # negatives tile (unpadded)
        ],
        out_specs=pl.BlockSpec((1, 1, 1), lambda i, k: (i, 0, 0)),
        compiler_params=pltpu.CompilerParams(
            dimension_semantics=("parallel", "arbitrary"),
            vmem_limit_bytes=48 * 1024 * 1024,
        ),
        cost_estimate=cost,
    )(pos_row, w_row, neg_scores)

    # Per-P-chunk partial sums (lets the P axis shard across TensorCores on v7x);
    # the final tiny reduction runs in XLA.
    return jnp.sum(partials)


def _reference_loss(pos_scores, neg_scores, weight=None):
    """Pure-JAX reference mirroring torch BCE-with-logits based logistic loss."""
    pos = pos_scores.astype(jnp.float32)
    neg = neg_scores.astype(jnp.float32)
    (P,) = pos.shape
    _, N = neg.shape
    w = jnp.ones((P,), jnp.float32) if weight is None else weight.astype(jnp.float32)
    pos_loss = jnp.sum(w * _softplus(-pos))
    neg_loss = jnp.sum(w[:, None] * _softplus(neg))
    return pos_loss + ((1.0 / N) if N > 0 else 0.0) * neg_loss


if __name__ == "__main__":
    key = jax.random.PRNGKey(0)
    k1, k2, k3, k4, k5, k6 = jax.random.split(key, 6)

    # Case 1: small single-tile path (P=8 positives, N=16 negatives per positive).
    P, N = 8, 16
    pos = jax.random.normal(k1, (P,), jnp.float32)
    neg = jax.random.normal(k2, (P, N), jnp.float32)
    w = jax.random.uniform(k3, (P,), jnp.float32) + 0.5

    out_w = jax.block_until_ready(logistic_loss(pos, neg, w))
    ref_w = _reference_loss(pos, neg, w)
    assert jnp.allclose(out_w, ref_w, rtol=1e-4, atol=1e-4), (out_w, ref_w)

    out_u = jax.block_until_ready(logistic_loss(pos, neg, None))
    ref_u = _reference_loss(pos, neg, None)
    assert jnp.allclose(out_u, ref_u, rtol=1e-4, atol=1e-4), (out_u, ref_u)

    # Case 2: exercises the tiled grid with in-kernel ragged-edge masking:
    # P=200 -> 2 parallel P-chunks of 128 (rows 200..255 masked),
    # N=300 -> 3 N-chunks of 128 (cols 300..383 masked).
    P2_, N2_ = 200, 300
    pos2 = jax.random.normal(k4, (P2_,), jnp.float32)
    neg2 = jax.random.normal(k5, (P2_, N2_), jnp.float32)
    w2 = jax.random.uniform(k6, (P2_,), jnp.float32) + 0.5
    out2 = jax.block_until_ready(logistic_loss(pos2, neg2, w2, max_tp=128, max_tn=128))
    ref2 = _reference_loss(pos2, neg2, w2)
    assert jnp.allclose(out2, ref2, rtol=1e-4, atol=1e-4), (out2, ref2)

    # Case 3: native-dtype (bf16) streaming with in-kernel f32 upcast.
    pos3 = pos.astype(jnp.bfloat16)
    neg3 = neg.astype(jnp.bfloat16)
    w3 = w.astype(jnp.bfloat16)
    out3 = jax.block_until_ready(logistic_loss(pos3, neg3, w3))
    ref3 = _reference_loss(pos3, neg3, w3)
    assert jnp.allclose(out3, ref3, rtol=1e-3, atol=1e-3), (out3, ref3)

    print("KERNEL_OK")
</pallas_src>

<mosaic_0001>
module attributes {stable_mosaic.version = 11 : i64} {
  func.func @_logistic_loss_kernel(%arg0: i32, %arg1: i32, %arg2: memref<1x8xf32, #tpu.memory_space<vmem>>, %arg3: memref<1x8xf32, #tpu.memory_space<vmem>>, %arg4: memref<8x16xf32, #tpu.memory_space<vmem>>, %arg5: memref<1x1x1xf32, #tpu.memory_space<vmem>>) attributes {dimension_semantics = [#tpu.dimension_semantics<parallel>, #tpu.dimension_semantics<arbitrary>], iteration_bounds = array<i64: 1, 1>, scalar_prefetch = 0 : i64, scratch_operands = 0 : i64, tpu.core_type = #tpu.core_type<tc>, window_params = [{transform_indices = @transform_0, window_bounds = array<i64: 1, 8>}, {transform_indices = @transform_1, window_bounds = array<i64: 1, 8>}, {transform_indices = @transform_2, window_bounds = array<i64: 8, 16>}, {transform_indices = @transform_3, window_bounds = array<i64: 1, 1, 1>}]} {
    %c0 = arith.constant 0 : index
    %c0_0 = arith.constant 0 : index
    %0 = vector.load %arg4[%c0, %c0_0] : memref<8x16xf32, #tpu.memory_space<vmem>>, vector<8x16xf32>
    %cst = arith.constant 0.000000e+00 : f32
    %1 = vector.broadcast %cst : f32 to vector<8x16xf32>
    %2 = arith.maximumf %0, %1 : vector<8x16xf32>
    %3 = math.absf %0 : vector<8x16xf32>
    %cst_1 = arith.constant 0.000000e+00 : f32
    %4 = vector.broadcast %cst_1 : f32 to vector<8x16xf32>
    %5 = arith.subf %4, %3 : vector<8x16xf32>
    %6 = math.exp %5 : vector<8x16xf32>
    %7 = math.log1p %6 : vector<8x16xf32>
    %8 = arith.addf %2, %7 : vector<8x16xf32>
    %cst_2 = arith.constant dense<0.000000e+00> : vector<8xf32>
    %9 = vector.multi_reduction <add>, %8, %cst_2 [1] : vector<8x16xf32> to vector<8xf32>
    %10 = vector.shape_cast %9 : vector<8xf32> to vector<8x1xf32>
    %c0_3 = arith.constant 0 : index
    %c0_4 = arith.constant 0 : index
    %11 = vector.load %arg3[%c0_3, %c0_4] : memref<1x8xf32, #tpu.memory_space<vmem>>, vector<1x8xf32>
    %cst_5 = arith.constant dense<0.000000e+00> : vector<1x1xf32>
    %12 = tpu.matmul %11, %10, %cst_5 {dimension_numbers = #tpu.dot_dimension_numbers<[1], [0], [0], [1], [0, 0, 1, 1], [], []>, precision = #tpu.contract_precision<fp32>} : vector<1x8xf32>, vector<8x1xf32>, vector<1x1xf32> -> vector<1x1xf32>
    %cst_6 = arith.constant 6.250000e-02 : f32
    %13 = vector.broadcast %cst_6 : f32 to vector<1x1xf32>
    %14 = arith.mulf %12, %13 : vector<1x1xf32>
    %c0_i32 = arith.constant 0 : i32
    %15 = arith.cmpi eq, %arg1, %c0_i32 : i32
    %16 = arith.extui %15 : i1 to i32
    %c0_i32_7 = arith.constant 0 : i32
    %17 = arith.cmpi ne, %16, %c0_i32_7 : i32
    scf.if %17 {
      %c0_14 = arith.constant 0 : index
      %c0_15 = arith.constant 0 : index
      %24 = vector.load %arg2[%c0_14, %c0_15] : memref<1x8xf32, #tpu.memory_space<vmem>>, vector<1x8xf32>
      %cst_16 = arith.constant 0.000000e+00 : f32
      %25 = vector.broadcast %cst_16 : f32 to vector<1x8xf32>
      %26 = arith.subf %25, %24 : vector<1x8xf32>
      %cst_17 = arith.constant 0.000000e+00 : f32
      %27 = vector.broadcast %cst_17 : f32 to vector<1x8xf32>
      %28 = arith.maximumf %26, %27 : vector<1x8xf32>
      %29 = math.absf %26 : vector<1x8xf32>
      %cst_18 = arith.constant 0.000000e+00 : f32
      %30 = vector.broadcast %cst_18 : f32 to vector<1x8xf32>
      %31 = arith.subf %30, %29 : vector<1x8xf32>
      %32 = math.exp %31 : vector<1x8xf32>
      %33 = math.log1p %32 : vector<1x8xf32>
      %34 = arith.addf %28, %33 : vector<1x8xf32>
      %35 = arith.mulf %11, %34 : vector<1x8xf32>
      %cst_19 = arith.constant dense<0.000000e+00> : vector<1xf32>
      %36 = vector.multi_reduction <add>, %35, %cst_19 [1] : vector<1x8xf32> to vector<1xf32>
      %37 = vector.shape_cast %36 : vector<1xf32> to vector<1x1xf32>
      %c0_20 = arith.constant 0 : index
      %c0_21 = arith.constant 0 : index
      %c0_22 = arith.constant 0 : index
      %38 = vector.load %arg5[%c0_20, %c0_21, %c0_22] : memref<1x1x1xf32, #tpu.memory_space<vmem>>, vector<1x1x1xf32>
      %39 = vector.shape_cast %38 : vector<1x1x1xf32> to vector<1x1xf32>
      %40 = vector.shape_cast %37 : vector<1x1xf32> to vector<1x1x1xf32>
      tpu.vector_store %arg5[%c0_20, %c0_21, %c0_22], %40 {strides = array<i32>} : memref<1x1x1xf32, #tpu.memory_space<vmem>>, vector<1x1x1xf32>,
    } else {
    }
    %c0_8 = arith.constant 0 : index
    %c0_9 = arith.constant 0 : index
    %c0_10 = arith.constant 0 : index
    %18 = vector.load %arg5[%c0_8, %c0_9, %c0_10] : memref<1x1x1xf32, #tpu.memory_space<vmem>>, vector<1x1x1xf32>
    %19 = vector.shape_cast %18 : vector<1x1x1xf32> to vector<1x1xf32>
    %20 = arith.addf %19, %14 : vector<1x1xf32>
    %c0_11 = arith.constant 0 : index
    %c0_12 = arith.constant 0 : index
    %c0_13 = arith.constant 0 : index
    %21 = vector.load %arg5[%c0_11, %c0_12, %c0_13] : memref<1x1x1xf32, #tpu.memory_space<vmem>>, vector<1x1x1xf32>
    %22 = vector.shape_cast %21 : vector<1x1x1xf32> to vector<1x1xf32>
    %23 = vector.shape_cast %20 : vector<1x1xf32> to vector<1x1x1xf32>
    tpu.vector_store %arg5[%c0_11, %c0_12, %c0_13], %23 {strides = array<i32>} : memref<1x1x1xf32, #tpu.memory_space<vmem>>, vector<1x1x1xf32>,
    return
  }
  func.func @transform_0(%arg0: i32, %arg1: i32) -> (i32, i32) {
    %c0_i32 = arith.constant 0 : i32
    %c0_i32_0 = arith.constant 0 : i32
    return %c0_i32, %arg0 : i32, i32
  }
  func.func @transform_1(%arg0: i32, %arg1: i32) -> (i32, i32) {
    %c0_i32 = arith.constant 0 : i32
    %c0_i32_0 = arith.constant 0 : i32
    return %c0_i32, %arg0 : i32, i32
  }
  func.func @transform_2(%arg0: i32, %arg1: i32) -> (i32, i32) {
    %c0_i32 = arith.constant 0 : i32
    return %arg0, %arg1 : i32, i32
  }
  func.func @transform_3(%arg0: i32, %arg1: i32) -> (i32, i32, i32) {
    %c0_i32 = arith.constant 0 : i32
    %c0_i32_0 = arith.constant 0 : i32
    %c0_i32_1 = arith.constant 0 : i32
    return %arg0, %c0_i32, %c0_i32_0 : i32, i32, i32
  }
}

</mosaic_0001>

<bundles_post_ra>
// kernel: tpu_custom_call.1
= control target key start
LH: loop header
LB: loop body
LE: loop exit
PB: predicated region body
PF: predicated region fallthrough
CT: control target
= control target key end

     0   :  { %8 = vsyncpa [#allocation3], 0  ;;  %s765_s0 = inlined_call_operand.hbm [shape: f32[1,8], index: 0, kind: input, shape index: {}]   ;;  %s766_s1 = inlined_call_operand.vmem [shape: f32[1,8], index: 1, kind: input, shape index: {}]   ;;  %s767_s2 = inlined_call_operand.hbm [shape: f32[8,16], index: 2, kind: input, shape index: {}]   ;;  %s768_s3 = inlined_call_operand.hbm [shape: f32[1,1,1], index: 3, kind: output, shape index: {}]  }
   0x1   :  { %9 = vsyncpa [#allocation6], 0 }
   0x2   :  { %10 = vsyncpa [#allocation4], 0  ;;  %s695_s12 = smov [#allocation2]   ;;  %s696_s14 = smov [#allocation5]  }
   0x3   :  { %s17_s13 = sshll.u32 %s695_s12, 4  ;;  %s29_s15 = sshll.u32 %s696_s14, 4  ;;  %s18_s13 = int_to_ptr.vmem [resolvable:$true] %s17_s13  ;;  %s30_s15 = int_to_ptr.vmem [resolvable:$true] %s29_s15 }
   0x4   :  { %s623_s18 = scalar_lea.hbm %s765_s0, 16 }
   0x5   :  { %p624_p0 = scmp.ne.s32.totalorder %s765_s0, %s623_s18  ;;  %p627_p1 = scmp.lt.u32.totalorder %s623_s18, %s765_s0 }
   0x7   :  { %p629_p2 = pnand %p627_p1, %p624_p0 }
   0x9   :  { %632 = shalt.err (!%p629_p2)
}
   0xa   :  { %s633_s23 = scalar_lea.vmem %s18_s13, 16  ;;  %s637_s24 = scalar_lea.vmem %s18_s13, 32 }
   0xb   :  { %p634_p3 = scmp.ne.s32.totalorder %s18_s13, %s633_s23  ;;  %p638_p4 = scmp.lt.s32.totalorder %s18_s13, %s18_s13 }
   0xc   :  { %p639_p5 = scmp.lt.s32.totalorder %s637_s24, %s633_s23 }
   0xe   :  { %p640_p6 = por %p639_p5, %p638_p4 }
  0x10   :  { %p641_p7 = pnand %p640_p6, %p634_p3 }
  0x12   :  { %644 = shalt.err (!%p641_p7)
}
  0x13   :  { %20 = dma.hbm_to_vmem [thread:$0]  %s765_s0, 16, %s18_s13, [#allocation3]  }
  0x14   :  { %s645_s29 = scalar_lea.hbm %s767_s2, 128 }
  0x15   :  { %p646_p8 = scmp.ne.s32.totalorder %s767_s2, %s645_s29  ;;  %p649_p9 = scmp.lt.u32.totalorder %s645_s29, %s767_s2 }
  0x17   :  { %p651_p10 = pnand %p649_p9, %p646_p8 }
  0x19   :  { %654 = shalt.err (!%p651_p10)
}
  0x1a   :  { %s655_s7 = scalar_lea.vmem %s30_s15, 128  ;;  %p660_p12 = scmp.lt.s32.totalorder %s30_s15, %s30_s15 }
  0x1b   :  { %p656_p11 = scmp.ne.s32.totalorder %s30_s15, %s655_s7  ;;  %p661_p13 = scmp.lt.s32.totalorder %s655_s7, %s655_s7 }
  0x1d   :  { %p662_p0 = por %p661_p13, %p660_p12 }
  0x1f   :  { %p663_p1 = pnand %p662_p0, %p656_p11 }
  0x21   :  { %666 = shalt.err (!%p663_p1)
}
  0x22   :  { %32 = dma.hbm_to_vmem [thread:$0]  %s767_s2, 128, %s30_s15, [#allocation6]  }
  0x23   :  { %689 = dma.done.wait [#allocation3], 16  }
  0x24   :  { %690 = vsyncadd [#allocation3], 4294967280 }
  0x25   :  { %691 = dma.done.wait [#allocation6], 128  }
  0x26   :  { %692 = vsyncadd [#allocation6], 4294967168  ;;  %v39_v0 = vld [vmem:[#allocation5] sm:$0xff]  ;;  %vm55_vm1 = vcmask 130048   ;;  %v697_v16 = vmov 0.0   ;;  %vm698_vm2 = vmmov 0  }
  0x27   :  { %v41_v1 = vand.u32 2147483647, %v39_v0  ;;  %v40_v11 = vmax.f32 %v39_v0, 0.0  ;;  %571 = vmatprep.subr.mxu1 %v697_v16  ;;  %586 = vmatprep.subr.mxu0 %v697_v16  ;;  %v515_v17 = vld [vmem:[#allocation2] sm:$0x1]  ;;  %vm533_vm4 = vcmask 57344  }
  0x28   :  { %573 = vmatprep.mubr.msk.f32.mxu1 %vm698_vm2, %v697_v16  ;;  %588 = vmatprep.mubr.msk.f32.mxu0 %vm698_vm2, %v697_v16  ;;  %v516_v18 = vsub.f32 0.0, %v515_v17  ;;  %v59_v33 = vld [vmem:[%s766_s1] sm:$0x1]  ;;  %vm60_vm5 = vcmask 64512   ;;  %vm537_vm6 = vcmask 0   ;;  %s699_s1 = smov [#allocation7]  }
  0x29   :  { %v42_v2 = vsub.f32 0.0, %v41_v1  ;;  %v62_v36 = vsel %vm60_vm5, %v59_v33, 0  ;;  %s549_s10 = sshll.u32 %s699_s1, 4  ;;  %s550_s10 = int_to_ptr.vmem [resolvable:$true] %s549_s10 }
  0x2a   :  { %v518_v19 = vand.u32 2147483647, %v516_v18  ;;  %v517_v29 = vmax.f32 %v516_v18, 0.0  ;;  %v130_v37 = vand.u32 4294901760, %v62_v36  ;;  %s667_s11 = scalar_lea.vmem %s550_s10, 16  ;;  %s671_s12 = scalar_lea.vmem %s550_s10, 32 }
  0x2b   :  { %v43_v3 = vmul.f32 1.442695, %v42_v2  ;;  %p668_p2 = scmp.ne.s32.totalorder %s550_s10, %s667_s11  ;;  %p672_p3 = scmp.lt.s32.totalorder %s550_s10, %s550_s10 }
  0x2c   :  { %v519_v20 = vsub.f32 0.0, %v518_v19  ;;  %v131_v38 = vsub.f32 %v62_v36, %v130_v37  ;;  %p673_p4 = scmp.lt.s32.totalorder %s671_s12, %s667_s11 }
  0x2d   :  { %615 = vpow2.f32 %v43_v3 }
  0x2e   :  { %v520_v21 = vmul.f32 1.442695, %v519_v20  ;;  %v132_v39 = vand.u32 4294901760, %v131_v38  ;;  %p674_p5 = por %p673_p4, %p672_p3 }
  0x30   :  { %v133_v40 = vsub.f32 %v131_v38, %v132_v39  ;;  %p675_p6 = pnand %p674_p5, %p668_p2 }
  0x32   :  { %v134_v42 = vand.u32 4294901760, %v133_v40 }
  0x37   :  { %v616_v4 = vpop.eup %615 }
  0x38   :  { %v45_v5 = vadd.f32 1.0, %v616_v4  ;;  %v48_v6 = vmul.f32 -0.5, %v616_v4  ;;  %v51_v8 = vand.u32 2147483647, %v616_v4 }
  0x3a   :  { %617 = vlog2.f32 %v45_v5  ;;  %v49_v7 = vadd.f32 1.0, %v48_v6  ;;  %vm52_vm0 = vcmp.lt.f32.partialorder %v51_v8, 0.0004427343 }
  0x3b   :  { %619 = vpow2.f32 %v520_v21 }
  0x3c   :  { %v50_v9 = vmul.f32 %v616_v4, %v49_v7 }
  0x44   :  { %v618_v10 = vpop.eup %617 }
  0x45   :  { %v47_v12 = vmul.f32 0.6931472, %v618_v10  ;;  %v620_v22 = vpop.eup %619 }
  0x46   :  { %v522_v23 = vadd.f32 1.0, %v620_v22  ;;  %v525_v24 = vmul.f32 -0.5, %v620_v22  ;;  %v528_v26 = vand.u32 2147483647, %v620_v22 }
  0x47   :  { %v53_v13 = vsel %vm52_vm0, %v50_v9, %v47_v12 }
  0x48   :  { %v54_v14 = vadd.f32 %v53_v13, %v40_v11  ;;  %621 = vlog2.f32 %v522_v23  ;;  %v526_v25 = vadd.f32 1.0, %v525_v24  ;;  %vm529_vm3 = vcmp.lt.f32.partialorder %v528_v26, 0.0004427343 }
  0x4a   :  { %v56_v15 = vsel %vm55_vm1, %v54_v14, 0.0  ;;  %v527_v27 = vmul.f32 %v620_v22, %v526_v25 }
  0x4b   :  { %57 = vadd.xlane.f32.xlu0 %v56_v15 }
  0x52   :  { %v622_v28 = vpop.eup %621 }
  0x53   :  { %v524_v30 = vmul.f32 0.6931472, %v622_v28 }
  0x55   :  { %v530_v31 = vsel %vm529_vm3, %v527_v27, %v524_v30 }
  0x56   :  { %v531_v32 = vadd.f32 %v530_v31, %v517_v29 }
  0x58   :  { %v532_v34 = vmul.f32 %v531_v32, %v59_v33 }
  0x5a   :  { %v534_v35 = vsel %vm533_vm4, %v532_v34, 0.0 }
  0x5b   :  { %535 = vadd.xlane.f32.xlu0 %v534_v35 }
  0xd8   :  { %v58_v41 = vpop.xlane.xlu0 %57 }
  0xd9   :  { %v65_v43 = vand.u32 4294901760, %v58_v41 }
  0xdb   :  { %v142_v44 = vsub.f32 %v58_v41, %v65_v43  ;;  %572 = vmatpush3.msra.mxu1 %v65_v43  ;;  %587 = vmatpush3.msra.mxu0 %v65_v43 }
  0xdc   :  { %574 = vmatmul.mubr.f32.vlgmr.msra.gmra.mrb[0].mxu1 %v134_v42  ;;  %589 = vmatmul.mubr.f32.vlgmr.msra.gmra.mrb[0].mxu0 %v132_v39 }
  0xdd   :  { %v143_v45 = vand.u32 4294901760, %v142_v44  ;;  %591 = vmatprep.subr.mxu0 %v697_v16  ;;  %576 = vmatprep.subr.mxu1 %v697_v16 }
  0xde   :  { %578 = vmatprep.mubr.msk.f32.mxu1 %vm698_vm2, %v697_v16  ;;  %593 = vmatprep.mubr.msk.f32.mxu0 %vm698_vm2, %v697_v16 }
  0xdf   :  { %v144_v46 = vsub.f32 %v142_v44, %v143_v45  ;;  %592 = vmatpush3.msra.mxu0 %v143_v45 }
  0xe0   :  { %596 = vmatprep.subr.mxu0 %v697_v16 }
  0xe1   :  { %v145_v47 = vand.u32 4294901760, %v144_v46 }
  0xe3   :  { %577 = vmatpush3.msra.mxu1 %v145_v47 }
  0xe4   :  { %579 = vmatmul.mubr.f32.vlgmr.msra.gmra.mrb[0].mxu1 %v130_v37  ;;  %581 = vmatprep.subr.mxu1 %v697_v16 }
  0xe5   :  { %594 = vmatmul.mubr.f32.vlgmr.msra.gmra.mrb[0].mxu0 %v130_v37  ;;  %582 = vmatpush3.msra.mxu1 %v142_v44 }
  0xe6   :  { %597 = vmatpush3.msra.mxu0 %v65_v43  ;;  %583 = vmatprep.mubr.msk.f32.mxu1 %vm698_vm2, %v697_v16 }
  0xe7   :  { %598 = vmatprep.mubr.msk.f32.mxu0 %vm698_vm2, %v697_v16 }
  0xe8   :  { %v536_v48 = vpop.xlane.xlu0 %535 }
  0xe9   :  { %538 = vst.msk [vmem:[#allocation7] sm:$0x1] %vm537_vm6, %v536_v48 }
  0xec   :  { %584 = vmatmul.mubr.f32.vlgmr.msra.gmra.mrb[0].mxu1 %v131_v38 }
  0xed   :  { %599 = vmatmul.mubr.f32.vlgmr.msra.gmra.mrb[0].mxu0 %v130_v37 }
  0xf0   :  { %v539_v54 = vld [vmem:[#allocation7] sm:$0x1] }
 0x1bf   :  { %v286_v49 = vpop.f32.mrb[0].mxu1 }
 0x1c0   :  { %v506_v50 = vpop.f32.mrb[0].mxu0  ;;  %v585_v51 = vpop.f32.mrb[1].mxu1 }
 0x1c1   :  { %v601_v52 = vadd.f32 %v506_v50, %v286_v49  ;;  %v600_v53 = vpop.f32.mrb[1].mxu0 }
 0x1c3   :  { %v510_v55 = vmul.f32 0.0625, %v601_v52 }
 0x1c5   :  { %v540_v56 = vadd.f32 %v539_v54, %v510_v55 }
 0x1c7   :  { %542 = vst.msk [vmem:[#allocation7] sm:$0x1] %vm537_vm6, %v540_v56 }
 0x1c8   :  { %678 = shalt.err (!%p675_p6)
}
 0x1c9   :  { %s679_s15 = scalar_lea.hbm %s768_s3, 16 }
 0x1ca   :  { %p680_p7 = scmp.ne.s32.totalorder %s768_s3, %s679_s15  ;;  %p683_p8 = scmp.lt.u32.totalorder %s679_s15, %s768_s3 }
 0x1cc   :  { %p685_p9 = pnand %p683_p8, %p680_p7 }
 0x1ce   :  { %688 = shalt.err (!%p685_p9)
}
 0x1cf   :  { %552 = dma.vmem_to_hbm [thread:$0]  %s550_s10, 16, %s768_s3, [#allocation4]  }
 0x1d0   :  { %693 = dma.done.wait [#allocation4], 16  }
 0x1d1   :  { %694 = vsyncadd [#allocation4], 4294967280 }
 0x1d2   :  { %556 = vsyncpa [#allocation3], 1 }
 0x1d3   :  { %557 = vsyncpa [#allocation6], 1 }
 0x1d4   :  { %558 = vsyncpa [#allocation4], 1 }

</bundles_post_ra>
